<compile_context>
chip_gen: v5e
topology: v5e:2x2
jax: 0.10.0
libtpu: 0.0.40
codegen_flags: <defaults>
</compile_context>

<pallas_src>
import functools

import jax
import jax.numpy as jnp
from jax import lax
from jax.experimental import pallas as pl
from jax.experimental.pallas import tpu as pltpu


def _round_up(value, multiple):
    return -(-value // multiple) * multiple


def _self_attention_kernel(*refs, num_heads, head_dim, q_tile, seq_len, has_mask):
    if has_mask:
        (x_ref, mask_ref, wq_ref, bq_ref, wk_ref, bk_ref, wv_ref, bv_ref,
         wo_ref, bo_ref, out_ref, k_s, v_s, ho_s) = refs
    else:
        (x_ref, wq_ref, bq_ref, wk_ref, bk_ref, wv_ref, bv_ref,
         wo_ref, bo_ref, out_ref, k_s, v_s, ho_s) = refs
        mask_ref = None

    dtype = x_ref.dtype              # MXU operand dtype (bf16 runs at native rate)
    seq_pad = x_ref.shape[1]
    qi = pl.program_id(1)

    # ---- K/V projection: once per batch element (qi == 0), cached head-major
    #      (H, S_pad, Dh) in VMEM so the hot loop slices heads on the leading
    #      axis.  NOTE: this relies on grid axis 1 staying "arbitrary"
    #      (sequential; qi == 0 visited first for every batch element).
    @pl.when(qi == 0)
    def _():
        x_all = x_ref[0]                                               # (S_pad, E)
        k_full = (jnp.dot(x_all, wk_ref[...],
                          preferred_element_type=jnp.float32)
                  + bk_ref[...]).astype(dtype)
        for h in range(num_heads):
            k_s[h] = k_full[:, h * head_dim:(h + 1) * head_dim]
        v_full = (jnp.dot(x_all, wv_ref[...],
                          preferred_element_type=jnp.float32)
                  + bv_ref[...]).astype(dtype)
        for h in range(num_heads):
            v_s[h] = v_full[:, h * head_dim:(h + 1) * head_dim]

    # ---- per-tile Q projection (1/sqrt(head_dim) pre-folded into wq/bq).
    row0 = pl.multiple_of(qi * q_tile, q_tile)
    x_tile = x_ref[0, pl.ds(row0, q_tile), :]                          # (tq, E)
    qt = (jnp.dot(x_tile, wq_ref[...],
                  preferred_element_type=jnp.float32)
          + bq_ref[...]).astype(dtype)                                 # (tq, E)

    # ---- additive key bias: user attention mask (+) padded-key mask (f32).
    bias = None
    if has_mask:
        bias = mask_ref[0].astype(jnp.float32)                         # (tq, S_pad)
    if seq_pad > seq_len:
        key_ids = lax.broadcasted_iota(jnp.int32, (1, seq_pad), 1)
        pad_bias = jnp.where(key_ids < seq_len, 0.0, -1e30).astype(jnp.float32)
        bias = pad_bias if bias is None else bias + pad_bias

    # TODO(synk): for very large head counts switch to lax.fori_loop with
    # dynamic head indexing; static unroll is fine for H <= ~16.
    for h in range(num_heads):
        lo = h * head_dim
        qh = qt[:, lo:lo + head_dim]                                   # (tq, Dh)
        kh = k_s[h]                                                    # (S_pad, Dh)
        vh = v_s[h]                                                    # (S_pad, Dh)

        # scores: contract the last dims directly (no explicit k transpose).
        s = lax.dot_general(qh, kh, (((1,), (1,)), ((), ())),
                            preferred_element_type=jnp.float32)        # (tq, S_pad)
        if bias is not None:
            s = s + bias

        # numerically stable softmax (f32 math; EUP reciprocal for the denom).
        # NOTE: a fully -inf-masked query row would produce NaN (same as the
        # pure-JAX / PyTorch reference).
        s = s - jnp.max(s, axis=-1, keepdims=True)
        p = jnp.exp(s)
        p = p * pl.reciprocal(jnp.sum(p, axis=-1, keepdims=True), approx=True)

        oh = jnp.dot(p.astype(dtype), vh,
                     preferred_element_type=jnp.float32)               # (tq, Dh)
        ho_s[:, lo:lo + head_dim] = oh.astype(dtype)

    # ---- single output projection: full K = E contraction, lane-dense N = E.
    out = (jnp.dot(ho_s[...], wo_ref[...],
                   preferred_element_type=jnp.float32) + bo_ref[...])
    out_ref[0] = out.astype(out_ref.dtype)


def _choose_tiling(seq_len):
    """Returns (padded_seq_len, query_tile)."""
    if seq_len <= 256:
        return seq_len, seq_len                 # single tile, block == full dims
    seq_pad = _round_up(seq_len, 128)
    q_tile = 256 if seq_pad % 256 == 0 else 128
    return seq_pad, q_tile


def self_attention(x, attention_mask, params, num_heads):
    """Forward pass of wav2vec2 SelfAttention (eval mode / dropout == 0).

    x: (B, S, E); attention_mask: None or additive float mask of shape
    (B, 1, S, S).  params = (wq, bq, wk, bk, wv, bv, wo, bo) with weights
    pre-transposed to (in, out) and biases shaped (1, E).
    Returns (attn_output, None) like the PyTorch module.
    """
    if x.ndim != 3:
        raise ValueError(f"expected (batch, seq, embed), got {x.shape}")
    B, S, E = x.shape
    if E % num_heads != 0:
        raise ValueError(f"embed_dim ({E}) not divisible by num_heads ({num_heads})")
    head_dim = E // num_heads
    scale = head_dim ** (-0.5)
    dtype = x.dtype
    itemsize = x.dtype.itemsize

    wq, bq, wk, bk, wv, bv, wo, bo = params
    # Weights/biases in the input dtype (bf16 x -> bf16 MXU passes, half the
    # weight DMA/VMEM); softmax scale folded into the q projection.
    wq_s = (wq * scale).astype(dtype)
    bq_s = (bq * scale).astype(dtype)
    wk = wk.astype(dtype); bk = bk.astype(dtype)
    wv = wv.astype(dtype); bv = bv.astype(dtype)
    wo = wo.astype(dtype); bo = bo.astype(dtype)

    has_mask = attention_mask is not None
    if has_mask and attention_mask.shape != (B, 1, S, S):
        raise ValueError(
            f"expected attention mask shape {(B, 1, S, S)}, got {attention_mask.shape}")

    s_pad, tq = _choose_tiling(S)
    nq = s_pad // tq

    x_p = x if s_pad == S else jnp.pad(x, ((0, 0), (0, s_pad - S), (0, 0)))
    if has_mask:
        # Mask ships in the input dtype (halves its recurring DMA stream for
        # bf16); cast to f32 in-kernel.  Padded keys get masked in-kernel.
        mask = attention_mask.reshape(B, S, S).astype(dtype)
        if s_pad != S:
            mask = jnp.pad(mask, ((0, 0), (0, s_pad - S), (0, s_pad - S)))

    kernel = functools.partial(
        _self_attention_kernel, num_heads=num_heads, head_dim=head_dim,
        q_tile=tq, seq_len=S, has_mask=has_mask)

    in_specs = [pl.BlockSpec((1, s_pad, E), lambda b, qi: (b, 0, 0))]   # x (full seq)
    inputs = [x_p]
    if has_mask:
        in_specs.append(pl.BlockSpec((1, tq, s_pad), lambda b, qi: (b, qi, 0)))
        inputs.append(mask)
    # TODO(synk): mark these constant-index weight blocks single-buffered
    # (pipeline_mode=pl.Buffered(1)) to shave a few MiB of VMEM.
    for w in (wq_s, bq_s, wk, bk, wv, bv, wo, bo):
        in_specs.append(pl.BlockSpec(w.shape, lambda b, qi: (0, 0)))
        inputs.append(w)

    # ---- VMEM budget (scratch + double-buffered blocks + large transients),
    #      capped per-generation from the queried VMEM capacity.
    e_lanes = _round_up(E, 128)
    dh_lanes = _round_up(head_dim, 128)
    sp_lanes = _round_up(s_pad, 128)
    kv_scratch = 2 * num_heads * s_pad * dh_lanes * itemsize
    ho_scratch = tq * e_lanes * itemsize
    x_blocks = 2 * s_pad * e_lanes * itemsize
    out_blocks = 2 * tq * e_lanes * itemsize
    w_blocks = 2 * (4 * E * e_lanes + 4 * e_lanes) * itemsize
    mask_blocks = 2 * tq * sp_lanes * itemsize if has_mask else 0
    transients = (s_pad * e_lanes * (4 + itemsize)      # qi==0 K/V projection temps
                  + tq * sp_lanes * 4                   # f32 scores
                  + tq * e_lanes * (4 + itemsize))      # q-tile temps
    est = (kv_scratch + ho_scratch + x_blocks + out_blocks + w_blocks
           + mask_blocks + transients)

    try:
        vmem_cap = int(getattr(pltpu.get_tpu_info(), "vmem_capacity_bytes", 0))
    except Exception:
        vmem_cap = 0
    if vmem_cap <= 0:
        vmem_cap = 64 * 1024 * 1024        # conservative (v7x-sized) default
    hard_cap = min(vmem_cap - (8 << 20), 100 << 20)   # ~56 MiB v7x, 100 MiB v5e/v6e
    vmem_limit = int(min(hard_cap, max(32 << 20, int(1.4 * est))))
    vmem_limit = max(vmem_limit, 24 << 20)

    out = pl.pallas_call(
        kernel,
        out_shape=jax.ShapeDtypeStruct((B, s_pad, E), dtype),
        grid_spec=pltpu.PrefetchScalarGridSpec(
            num_scalar_prefetch=0,
            grid=(B, nq),
            in_specs=in_specs,
            out_specs=pl.BlockSpec((1, tq, E), lambda b, qi: (b, qi, 0)),
            scratch_shapes=[
                pltpu.VMEM((num_heads, s_pad, head_dim), dtype),   # K, head-major
                pltpu.VMEM((num_heads, s_pad, head_dim), dtype),   # V, head-major
                pltpu.VMEM((tq, E), dtype),                        # head-output slab
            ]),
        # TODO(synk): for B == 1 on v7x (2 TensorCores), hoist the K/V
        # projection out of the kernel so the qi axis can be "parallel".
        compiler_params=pltpu.CompilerParams(
            dimension_semantics=("parallel", "arbitrary"),
            vmem_limit_bytes=vmem_limit),
    )(*inputs)

    if s_pad != S:
        out = out[:, :S, :]
    # Module returns (attn_output, None) — position_bias path unused here.
    return out, None


def _reference(x, attention_mask, params, num_heads):
    """Pure-JAX reference mirroring F.scaled_dot_product_attention semantics."""
    wq, bq, wk, bk, wv, bv, wo, bo = params
    B, S, E = x.shape
    H = num_heads
    Dh = E // H
    q = (x @ wq + bq).reshape(B, S, H, Dh).transpose(0, 2, 1, 3)
    k = (x @ wk + bk).reshape(B, S, H, Dh).transpose(0, 2, 1, 3)
    v = (x @ wv + bv).reshape(B, S, H, Dh).transpose(0, 2, 1, 3)
    scores = jnp.einsum('bhqd,bhkd->bhqk', q, k) * (Dh ** -0.5)
    if attention_mask is not None:
        scores = scores + attention_mask
    p = jax.nn.softmax(scores, axis=-1)
    o = jnp.einsum('bhqk,bhkd->bhqd', p, v)
    o = o.transpose(0, 2, 1, 3).reshape(B, S, E)
    return o @ wo + bo


def make_params(key, embed_dim):
    """Deterministic nn.Linear-style params, pre-transposed to (in, out)."""
    ks = jax.random.split(key, 8)
    bound = 1.0 / (embed_dim ** 0.5)

    def linear(kw, kb):
        w = jax.random.uniform(kw, (embed_dim, embed_dim), jnp.float32, -bound, bound)
        b = jax.random.uniform(kb, (1, embed_dim), jnp.float32, -bound, bound)
        return w, b

    wq, bq = linear(ks[0], ks[1])
    wk, bk = linear(ks[2], ks[3])
    wv, bv = linear(ks[4], ks[5])
    wo, bo = linear(ks[6], ks[7])
    return (wq, bq, wk, bk, wv, bv, wo, bo)


if __name__ == "__main__":
    key = jax.random.PRNGKey(0)
    k_x, k_m, k_p, k_x2, k_m2 = jax.random.split(key, 5)

    batch, seq, embed_dim, num_heads = 2, 8, 32, 4
    x = jax.random.normal(k_x, (batch, seq, embed_dim), dtype=jnp.float32)
    # additive float attention mask, shape (B, 1, S, S)
    attention_mask = -0.5 * jax.random.uniform(
        k_m, (batch, 1, seq, seq), dtype=jnp.float32)
    params = make_params(k_p, embed_dim)

    # 1) masked path, f32
    out, aux = self_attention(x, attention_mask, params, num_heads)
    out = jax.block_until_ready(out)
    ref = _reference(x, attention_mask, params, num_heads)
    assert aux is None
    assert out.shape == (batch, seq, embed_dim)
    # approx reciprocal in the softmax denominator trades ~1e-4 relative error
    assert jnp.allclose(out, ref, atol=2e-3, rtol=2e-3), float(jnp.max(jnp.abs(out - ref)))

    # 2) no-mask path, f32 (mask input and mask add skipped entirely)
    out_nm, _ = self_attention(x, None, params, num_heads)
    out_nm = jax.block_until_ready(out_nm)
    ref_nm = _reference(x, None, params, num_heads)
    assert jnp.allclose(out_nm, ref_nm, atol=2e-3, rtol=2e-3), \
        float(jnp.max(jnp.abs(out_nm - ref_nm)))

    # 3) bf16 inputs (bf16 MXU operands, bf16 K/V scratch, bf16 weights)
    x_bf = x.astype(jnp.bfloat16)
    out_bf, _ = self_attention(x_bf, None, params, num_heads)
    out_bf = jax.block_until_ready(out_bf)
    params_bf = tuple(p.astype(jnp.bfloat16).astype(jnp.float32) for p in params)
    ref_bf = _reference(x_bf.astype(jnp.float32), None, params_bf, num_heads)
    assert out_bf.dtype == jnp.bfloat16
    assert jnp.allclose(out_bf.astype(jnp.float32), ref_bf, atol=3e-2, rtol=3e-2), \
        float(jnp.max(jnp.abs(out_bf.astype(jnp.float32) - ref_bf)))

    # 4) non-divisible sequence (260 -> padded to 384, tq=128, pad keys masked)
    seq2 = 260
    x2 = jax.random.normal(k_x2, (1, seq2, embed_dim), dtype=jnp.float32)
    mask2 = -0.5 * jax.random.uniform(k_m2, (1, 1, seq2, seq2), dtype=jnp.float32)
    out2, _ = self_attention(x2, mask2, params, num_heads)
    out2 = jax.block_until_ready(out2)
    ref2 = _reference(x2, mask2, params, num_heads)
    assert out2.shape == (1, seq2, embed_dim)
    assert jnp.allclose(out2, ref2, atol=2e-3, rtol=2e-3), \
        float(jnp.max(jnp.abs(out2 - ref2)))

    print("KERNEL_OK")
</pallas_src>

<mosaic_0001>
module attributes {stable_mosaic.version = 11 : i64} {
  func.func @_self_attention_kernel(%arg0: i32, %arg1: i32, %arg2: memref<1x8x32xf32, #tpu.memory_space<vmem>>, %arg3: memref<1x8x8xf32, #tpu.memory_space<vmem>>, %arg4: memref<32x32xf32, #tpu.memory_space<vmem>>, %arg5: memref<1x32xf32, #tpu.memory_space<vmem>>, %arg6: memref<32x32xf32, #tpu.memory_space<vmem>>, %arg7: memref<1x32xf32, #tpu.memory_space<vmem>>, %arg8: memref<32x32xf32, #tpu.memory_space<vmem>>, %arg9: memref<1x32xf32, #tpu.memory_space<vmem>>, %arg10: memref<32x32xf32, #tpu.memory_space<vmem>>, %arg11: memref<1x32xf32, #tpu.memory_space<vmem>>, %arg12: memref<1x8x32xf32, #tpu.memory_space<vmem>>, %arg13: memref<4x8x8xf32, #tpu.memory_space<vmem>>, %arg14: memref<4x8x8xf32, #tpu.memory_space<vmem>>, %arg15: memref<8x32xf32, #tpu.memory_space<vmem>>) attributes {dimension_semantics = [#tpu.dimension_semantics<parallel>, #tpu.dimension_semantics<arbitrary>], iteration_bounds = array<i64: 2, 1>, scalar_prefetch = 0 : i64, scratch_operands = 3 : i64, tpu.core_type = #tpu.core_type<tc>, window_params = [{transform_indices = @transform_0, window_bounds = array<i64: 1, 8, 32>}, {transform_indices = @transform_1, window_bounds = array<i64: 1, 8, 8>}, {pipeline_mode = #tpu.pipeline_mode<synchronous>, transform_indices = @transform_2, window_bounds = array<i64: 32, 32>}, {pipeline_mode = #tpu.pipeline_mode<synchronous>, transform_indices = @transform_3, window_bounds = array<i64: 1, 32>}, {pipeline_mode = #tpu.pipeline_mode<synchronous>, transform_indices = @transform_4, window_bounds = array<i64: 32, 32>}, {pipeline_mode = #tpu.pipeline_mode<synchronous>, transform_indices = @transform_5, window_bounds = array<i64: 1, 32>}, {pipeline_mode = #tpu.pipeline_mode<synchronous>, transform_indices = @transform_6, window_bounds = array<i64: 32, 32>}, {pipeline_mode = #tpu.pipeline_mode<synchronous>, transform_indices = @transform_7, window_bounds = array<i64: 1, 32>}, {pipeline_mode = #tpu.pipeline_mode<synchronous>, transform_indices = @transform_8, window_bounds = array<i64: 32, 32>}, {pipeline_mode = #tpu.pipeline_mode<synchronous>, transform_indices = @transform_9, window_bounds = array<i64: 1, 32>}, {transform_indices = @transform_10, window_bounds = array<i64: 1, 8, 32>}]} {
    %c0_i32 = arith.constant 0 : i32
    %0 = arith.cmpi eq, %arg1, %c0_i32 : i32
    %1 = arith.extui %0 : i1 to i32
    %c0_i32_0 = arith.constant 0 : i32
    %2 = arith.cmpi ne, %1, %c0_i32_0 : i32
    scf.if %2 {
      %c0_61 = arith.constant 0 : index
      %c0_62 = arith.constant 0 : index
      %c0_63 = arith.constant 0 : index
      %100 = vector.load %arg2[%c0_61, %c0_62, %c0_63] : memref<1x8x32xf32, #tpu.memory_space<vmem>>, vector<1x8x32xf32>
      %101 = vector.shape_cast %100 : vector<1x8x32xf32> to vector<8x32xf32>
      %c0_64 = arith.constant 0 : index
      %c0_65 = arith.constant 0 : index
      %102 = vector.load %arg6[%c0_64, %c0_65] : memref<32x32xf32, #tpu.memory_space<vmem>>, vector<32x32xf32>
      %cst_66 = arith.constant dense<0.000000e+00> : vector<8x32xf32>
      %103 = tpu.matmul %101, %102, %cst_66 {dimension_numbers = #tpu.dot_dimension_numbers<[1], [0], [0], [1], [0, 0, 1, 1], [], []>} : vector<8x32xf32>, vector<32x32xf32>, vector<8x32xf32> -> vector<8x32xf32>
      %c0_67 = arith.constant 0 : index
      %c0_68 = arith.constant 0 : index
      %104 = vector.load %arg7[%c0_67, %c0_68] : memref<1x32xf32, #tpu.memory_space<vmem>>, vector<1x32xf32>
      %105 = vector.broadcast %104 : vector<1x32xf32> to vector<8x32xf32>
      %106 = arith.addf %103, %105 : vector<8x32xf32>
      %107 = vector.extract_strided_slice %106 {offsets = [0, 0], sizes = [8, 8], strides = [1, 1]} : vector<8x32xf32> to vector<8x8xf32>
      %c0_69 = arith.constant 0 : index
      %c0_70 = arith.constant 0 : index
      %c0_71 = arith.constant 0 : index
      %108 = vector.load %arg13[%c0_69, %c0_70, %c0_71] : memref<4x8x8xf32, #tpu.memory_space<vmem>>, vector<1x8x8xf32>
      %109 = vector.shape_cast %108 : vector<1x8x8xf32> to vector<8x8xf32>
      %110 = vector.shape_cast %107 : vector<8x8xf32> to vector<1x8x8xf32>
      tpu.vector_store %arg13[%c0_69, %c0_70, %c0_71], %110 {strides = array<i32>} : memref<4x8x8xf32, #tpu.memory_space<vmem>>, vector<1x8x8xf32>,
      %111 = vector.extract_strided_slice %106 {offsets = [0, 8], sizes = [8, 8], strides = [1, 1]} : vector<8x32xf32> to vector<8x8xf32>
      %c1_72 = arith.constant 1 : index
      %c0_73 = arith.constant 0 : index
      %c0_74 = arith.constant 0 : index
      %112 = vector.load %arg13[%c1_72, %c0_73, %c0_74] : memref<4x8x8xf32, #tpu.memory_space<vmem>>, vector<1x8x8xf32>
      %113 = vector.shape_cast %112 : vector<1x8x8xf32> to vector<8x8xf32>
      %114 = vector.shape_cast %111 : vector<8x8xf32> to vector<1x8x8xf32>
      tpu.vector_store %arg13[%c1_72, %c0_73, %c0_74], %114 {strides = array<i32>} : memref<4x8x8xf32, #tpu.memory_space<vmem>>, vector<1x8x8xf32>,
      %115 = vector.extract_strided_slice %106 {offsets = [0, 16], sizes = [8, 8], strides = [1, 1]} : vector<8x32xf32> to vector<8x8xf32>
      %c2_75 = arith.constant 2 : index
      %c0_76 = arith.constant 0 : index
      %c0_77 = arith.constant 0 : index
      %116 = vector.load %arg13[%c2_75, %c0_76, %c0_77] : memref<4x8x8xf32, #tpu.memory_space<vmem>>, vector<1x8x8xf32>
      %117 = vector.shape_cast %116 : vector<1x8x8xf32> to vector<8x8xf32>
      %118 = vector.shape_cast %115 : vector<8x8xf32> to vector<1x8x8xf32>
      tpu.vector_store %arg13[%c2_75, %c0_76, %c0_77], %118 {strides = array<i32>} : memref<4x8x8xf32, #tpu.memory_space<vmem>>, vector<1x8x8xf32>,
      %119 = vector.extract_strided_slice %106 {offsets = [0, 24], sizes = [8, 8], strides = [1, 1]} : vector<8x32xf32> to vector<8x8xf32>
      %c3_78 = arith.constant 3 : index
      %c0_79 = arith.constant 0 : index
      %c0_80 = arith.constant 0 : index
      %120 = vector.load %arg13[%c3_78, %c0_79, %c0_80] : memref<4x8x8xf32, #tpu.memory_space<vmem>>, vector<1x8x8xf32>
      %121 = vector.shape_cast %120 : vector<1x8x8xf32> to vector<8x8xf32>
      %122 = vector.shape_cast %119 : vector<8x8xf32> to vector<1x8x8xf32>
      tpu.vector_store %arg13[%c3_78, %c0_79, %c0_80], %122 {strides = array<i32>} : memref<4x8x8xf32, #tpu.memory_space<vmem>>, vector<1x8x8xf32>,
      %c0_81 = arith.constant 0 : index
      %c0_82 = arith.constant 0 : index
      %123 = vector.load %arg8[%c0_81, %c0_82] : memref<32x32xf32, #tpu.memory_space<vmem>>, vector<32x32xf32>
      %cst_83 = arith.constant dense<0.000000e+00> : vector<8x32xf32>
      %124 = tpu.matmul %101, %123, %cst_83 {dimension_numbers = #tpu.dot_dimension_numbers<[1], [0], [0], [1], [0, 0, 1, 1], [], []>} : vector<8x32xf32>, vector<32x32xf32>, vector<8x32xf32> -> vector<8x32xf32>
      %c0_84 = arith.constant 0 : index
      %c0_85 = arith.constant 0 : index
      %125 = vector.load %arg9[%c0_84, %c0_85] : memref<1x32xf32, #tpu.memory_space<vmem>>, vector<1x32xf32>
      %126 = vector.broadcast %125 : vector<1x32xf32> to vector<8x32xf32>
      %127 = arith.addf %124, %126 : vector<8x32xf32>
      %128 = vector.extract_strided_slice %127 {offsets = [0, 0], sizes = [8, 8], strides = [1, 1]} : vector<8x32xf32> to vector<8x8xf32>
      %c0_86 = arith.constant 0 : index
      %c0_87 = arith.constant 0 : index
      %c0_88 = arith.constant 0 : index
      %129 = vector.load %arg14[%c0_86, %c0_87, %c0_88] : memref<4x8x8xf32, #tpu.memory_space<vmem>>, vector<1x8x8xf32>
      %130 = vector.shape_cast %129 : vector<1x8x8xf32> to vector<8x8xf32>
      %131 = vector.shape_cast %128 : vector<8x8xf32> to vector<1x8x8xf32>
      tpu.vector_store %arg14[%c0_86, %c0_87, %c0_88], %131 {strides = array<i32>} : memref<4x8x8xf32, #tpu.memory_space<vmem>>, vector<1x8x8xf32>,
      %132 = vector.extract_strided_slice %127 {offsets = [0, 8], sizes = [8, 8], strides = [1, 1]} : vector<8x32xf32> to vector<8x8xf32>
      %c1_89 = arith.constant 1 : index
      %c0_90 = arith.constant 0 : index
      %c0_91 = arith.constant 0 : index
      %133 = vector.load %arg14[%c1_89, %c0_90, %c0_91] : memref<4x8x8xf32, #tpu.memory_space<vmem>>, vector<1x8x8xf32>
      %134 = vector.shape_cast %133 : vector<1x8x8xf32> to vector<8x8xf32>
      %135 = vector.shape_cast %132 : vector<8x8xf32> to vector<1x8x8xf32>
      tpu.vector_store %arg14[%c1_89, %c0_90, %c0_91], %135 {strides = array<i32>} : memref<4x8x8xf32, #tpu.memory_space<vmem>>, vector<1x8x8xf32>,
      %136 = vector.extract_strided_slice %127 {offsets = [0, 16], sizes = [8, 8], strides = [1, 1]} : vector<8x32xf32> to vector<8x8xf32>
      %c2_92 = arith.constant 2 : index
      %c0_93 = arith.constant 0 : index
      %c0_94 = arith.constant 0 : index
      %137 = vector.load %arg14[%c2_92, %c0_93, %c0_94] : memref<4x8x8xf32, #tpu.memory_space<vmem>>, vector<1x8x8xf32>
      %138 = vector.shape_cast %137 : vector<1x8x8xf32> to vector<8x8xf32>
      %139 = vector.shape_cast %136 : vector<8x8xf32> to vector<1x8x8xf32>
      tpu.vector_store %arg14[%c2_92, %c0_93, %c0_94], %139 {strides = array<i32>} : memref<4x8x8xf32, #tpu.memory_space<vmem>>, vector<1x8x8xf32>,
      %140 = vector.extract_strided_slice %127 {offsets = [0, 24], sizes = [8, 8], strides = [1, 1]} : vector<8x32xf32> to vector<8x8xf32>
      %c3_95 = arith.constant 3 : index
      %c0_96 = arith.constant 0 : index
      %c0_97 = arith.constant 0 : index
      %141 = vector.load %arg14[%c3_95, %c0_96, %c0_97] : memref<4x8x8xf32, #tpu.memory_space<vmem>>, vector<1x8x8xf32>
      %142 = vector.shape_cast %141 : vector<1x8x8xf32> to vector<8x8xf32>
      %143 = vector.shape_cast %140 : vector<8x8xf32> to vector<1x8x8xf32>
      tpu.vector_store %arg14[%c3_95, %c0_96, %c0_97], %143 {strides = array<i32>} : memref<4x8x8xf32, #tpu.memory_space<vmem>>, vector<1x8x8xf32>,
    } else {
    }
    %c8_i32 = arith.constant 8 : i32
    %3 = arith.muli %arg1, %c8_i32 : i32
    %4 = tpu.assume_multiple %3, 8 : i32
    %c0 = arith.constant 0 : index
    %5 = arith.index_cast %4 : i32 to index
    %c0_1 = arith.constant 0 : index
    %6 = vector.load %arg2[%c0, %5, %c0_1] : memref<1x8x32xf32, #tpu.memory_space<vmem>>, vector<1x8x32xf32>
    %7 = vector.shape_cast %6 : vector<1x8x32xf32> to vector<8x32xf32>
    %c0_2 = arith.constant 0 : index
    %c0_3 = arith.constant 0 : index
    %8 = vector.load %arg4[%c0_2, %c0_3] : memref<32x32xf32, #tpu.memory_space<vmem>>, vector<32x32xf32>
    %cst = arith.constant dense<0.000000e+00> : vector<8x32xf32>
    %9 = tpu.matmul %7, %8, %cst {dimension_numbers = #tpu.dot_dimension_numbers<[1], [0], [0], [1], [0, 0, 1, 1], [], []>} : vector<8x32xf32>, vector<32x32xf32>, vector<8x32xf32> -> vector<8x32xf32>
    %c0_4 = arith.constant 0 : index
    %c0_5 = arith.constant 0 : index
    %10 = vector.load %arg5[%c0_4, %c0_5] : memref<1x32xf32, #tpu.memory_space<vmem>>, vector<1x32xf32>
    %11 = vector.broadcast %10 : vector<1x32xf32> to vector<8x32xf32>
    %12 = arith.addf %9, %11 : vector<8x32xf32>
    %c0_6 = arith.constant 0 : index
    %c0_7 = arith.constant 0 : index
    %c0_8 = arith.constant 0 : index
    %13 = vector.load %arg3[%c0_6, %c0_7, %c0_8] : memref<1x8x8xf32, #tpu.memory_space<vmem>>, vector<1x8x8xf32>
    %14 = vector.shape_cast %13 : vector<1x8x8xf32> to vector<8x8xf32>
    %15 = vector.extract_strided_slice %12 {offsets = [0, 0], sizes = [8, 8], strides = [1, 1]} : vector<8x32xf32> to vector<8x8xf32>
    %c0_9 = arith.constant 0 : index
    %c0_10 = arith.constant 0 : index
    %c0_11 = arith.constant 0 : index
    %16 = vector.load %arg13[%c0_9, %c0_10, %c0_11] : memref<4x8x8xf32, #tpu.memory_space<vmem>>, vector<1x8x8xf32>
    %17 = vector.shape_cast %16 : vector<1x8x8xf32> to vector<8x8xf32>
    %c0_12 = arith.constant 0 : index
    %c0_13 = arith.constant 0 : index
    %c0_14 = arith.constant 0 : index
    %18 = vector.load %arg14[%c0_12, %c0_13, %c0_14] : memref<4x8x8xf32, #tpu.memory_space<vmem>>, vector<1x8x8xf32>
    %19 = vector.shape_cast %18 : vector<1x8x8xf32> to vector<8x8xf32>
    %cst_15 = arith.constant dense<0.000000e+00> : vector<8x8xf32>
    %20 = tpu.matmul %15, %17, %cst_15 {dimension_numbers = #tpu.dot_dimension_numbers<[1], [1], [0], [0], [0, 0, 1, 0], [], []>} : vector<8x8xf32>, vector<8x8xf32>, vector<8x8xf32> -> vector<8x8xf32>
    %21 = arith.addf %20, %14 : vector<8x8xf32>
    %cst_16 = arith.constant dense<0xFF800000> : vector<8xf32>
    %22 = vector.multi_reduction <maximumf>, %21, %cst_16 [1] : vector<8x8xf32> to vector<8xf32>
    %23 = vector.shape_cast %22 : vector<8xf32> to vector<8x1xf32>
    %24 = vector.broadcast %23 : vector<8x1xf32> to vector<8x8xf32>
    %25 = arith.subf %21, %24 : vector<8x8xf32>
    %26 = math.exp %25 : vector<8x8xf32>
    %cst_17 = arith.constant dense<0.000000e+00> : vector<8xf32>
    %27 = vector.multi_reduction <add>, %26, %cst_17 [1] : vector<8x8xf32> to vector<8xf32>
    %28 = vector.shape_cast %27 : vector<8xf32> to vector<8x1xf32>
    %29 = tpu.reciprocal %28 {approx = true} : vector<8x1xf32> -> vector<8x1xf32>
    %30 = vector.broadcast %29 : vector<8x1xf32> to vector<8x8xf32>
    %31 = arith.mulf %26, %30 : vector<8x8xf32>
    %cst_18 = arith.constant dense<0.000000e+00> : vector<8x8xf32>
    %32 = tpu.matmul %31, %19, %cst_18 {dimension_numbers = #tpu.dot_dimension_numbers<[1], [0], [0], [1], [0, 0, 1, 1], [], []>} : vector<8x8xf32>, vector<8x8xf32>, vector<8x8xf32> -> vector<8x8xf32>
    %c0_19 = arith.constant 0 : index
    %c0_20 = arith.constant 0 : index
    %33 = vector.load %arg15[%c0_19, %c0_20] : memref<8x32xf32, #tpu.memory_space<vmem>>, vector<8x8xf32>
    tpu.vector_store %arg15[%c0_19, %c0_20], %32 {strides = array<i32>} : memref<8x32xf32, #tpu.memory_space<vmem>>, vector<8x8xf32>,
    %34 = vector.extract_strided_slice %12 {offsets = [0, 8], sizes = [8, 8], strides = [1, 1]} : vector<8x32xf32> to vector<8x8xf32>
    %c1 = arith.constant 1 : index
    %c0_21 = arith.constant 0 : index
    %c0_22 = arith.constant 0 : index
    %35 = vector.load %arg13[%c1, %c0_21, %c0_22] : memref<4x8x8xf32, #tpu.memory_space<vmem>>, vector<1x8x8xf32>
    %36 = vector.shape_cast %35 : vector<1x8x8xf32> to vector<8x8xf32>
    %c1_23 = arith.constant 1 : index
    %c0_24 = arith.constant 0 : index
    %c0_25 = arith.constant 0 : index
    %37 = vector.load %arg14[%c1_23, %c0_24, %c0_25] : memref<4x8x8xf32, #tpu.memory_space<vmem>>, vector<1x8x8xf32>
    %38 = vector.shape_cast %37 : vector<1x8x8xf32> to vector<8x8xf32>
    %cst_26 = arith.constant dense<0.000000e+00> : vector<8x8xf32>
    %39 = tpu.matmul %34, %36, %cst_26 {dimension_numbers = #tpu.dot_dimension_numbers<[1], [1], [0], [0], [0, 0, 1, 0], [], []>} : vector<8x8xf32>, vector<8x8xf32>, vector<8x8xf32> -> vector<8x8xf32>
    %40 = arith.addf %39, %14 : vector<8x8xf32>
    %cst_27 = arith.constant dense<0xFF800000> : vector<8xf32>
    %41 = vector.multi_reduction <maximumf>, %40, %cst_27 [1] : vector<8x8xf32> to vector<8xf32>
    %42 = vector.shape_cast %41 : vector<8xf32> to vector<8x1xf32>
    %43 = vector.broadcast %42 : vector<8x1xf32> to vector<8x8xf32>
    %44 = arith.subf %40, %43 : vector<8x8xf32>
    %45 = math.exp %44 : vector<8x8xf32>
    %cst_28 = arith.constant dense<0.000000e+00> : vector<8xf32>
    %46 = vector.multi_reduction <add>, %45, %cst_28 [1] : vector<8x8xf32> to vector<8xf32>
    %47 = vector.shape_cast %46 : vector<8xf32> to vector<8x1xf32>
    %48 = tpu.reciprocal %47 {approx = true} : vector<8x1xf32> -> vector<8x1xf32>
    %49 = vector.broadcast %48 : vector<8x1xf32> to vector<8x8xf32>
    %50 = arith.mulf %45, %49 : vector<8x8xf32>
    %cst_29 = arith.constant dense<0.000000e+00> : vector<8x8xf32>
    %51 = tpu.matmul %50, %38, %cst_29 {dimension_numbers = #tpu.dot_dimension_numbers<[1], [0], [0], [1], [0, 0, 1, 1], [], []>} : vector<8x8xf32>, vector<8x8xf32>, vector<8x8xf32> -> vector<8x8xf32>
    %c0_30 = arith.constant 0 : index
    %c8 = arith.constant 8 : index
    %52 = vector.load %arg15[%c0_30, %c8] : memref<8x32xf32, #tpu.memory_space<vmem>>, vector<8x8xf32>
    tpu.vector_store %arg15[%c0_30, %c8], %51 {strides = array<i32>} : memref<8x32xf32, #tpu.memory_space<vmem>>, vector<8x8xf32>,
    %53 = vector.extract_strided_slice %12 {offsets = [0, 16], sizes = [8, 8], strides = [1, 1]} : vector<8x32xf32> to vector<8x8xf32>
    %c2 = arith.constant 2 : index
    %c0_31 = arith.constant 0 : index
    %c0_32 = arith.constant 0 : index
    %54 = vector.load %arg13[%c2, %c0_31, %c0_32] : memref<4x8x8xf32, #tpu.memory_space<vmem>>, vector<1x8x8xf32>
    %55 = vector.shape_cast %54 : vector<1x8x8xf32> to vector<8x8xf32>
    %c2_33 = arith.constant 2 : index
    %c0_34 = arith.constant 0 : index
    %c0_35 = arith.constant 0 : index
    %56 = vector.load %arg14[%c2_33, %c0_34, %c0_35] : memref<4x8x8xf32, #tpu.memory_space<vmem>>, vector<1x8x8xf32>
    %57 = vector.shape_cast %56 : vector<1x8x8xf32> to vector<8x8xf32>
    %cst_36 = arith.constant dense<0.000000e+00> : vector<8x8xf32>
    %58 = tpu.matmul %53, %55, %cst_36 {dimension_numbers = #tpu.dot_dimension_numbers<[1], [1], [0], [0], [0, 0, 1, 0], [], []>} : vector<8x8xf32>, vector<8x8xf32>, vector<8x8xf32> -> vector<8x8xf32>
    %59 = arith.addf %58, %14 : vector<8x8xf32>
    %cst_37 = arith.constant dense<0xFF800000> : vector<8xf32>
    %60 = vector.multi_reduction <maximumf>, %59, %cst_37 [1] : vector<8x8xf32> to vector<8xf32>
    %61 = vector.shape_cast %60 : vector<8xf32> to vector<8x1xf32>
    %62 = vector.broadcast %61 : vector<8x1xf32> to vector<8x8xf32>
    %63 = arith.subf %59, %62 : vector<8x8xf32>
    %64 = math.exp %63 : vector<8x8xf32>
    %cst_38 = arith.constant dense<0.000000e+00> : vector<8xf32>
    %65 = vector.multi_reduction <add>, %64, %cst_38 [1] : vector<8x8xf32> to vector<8xf32>
    %66 = vector.shape_cast %65 : vector<8xf32> to vector<8x1xf32>
    %67 = tpu.reciprocal %66 {approx = true} : vector<8x1xf32> -> vector<8x1xf32>
    %68 = vector.broadcast %67 : vector<8x1xf32> to vector<8x8xf32>
    %69 = arith.mulf %64, %68 : vector<8x8xf32>
    %cst_39 = arith.constant dense<0.000000e+00> : vector<8x8xf32>
    %70 = tpu.matmul %69, %57, %cst_39 {dimension_numbers = #tpu.dot_dimension_numbers<[1], [0], [0], [1], [0, 0, 1, 1], [], []>} : vector<8x8xf32>, vector<8x8xf32>, vector<8x8xf32> -> vector<8x8xf32>
    %c0_40 = arith.constant 0 : index
    %c16 = arith.constant 16 : index
    %71 = vector.load %arg15[%c0_40, %c16] : memref<8x32xf32, #tpu.memory_space<vmem>>, vector<8x8xf32>
    tpu.vector_store %arg15[%c0_40, %c16], %70 {strides = array<i32>} : memref<8x32xf32, #tpu.memory_space<vmem>>, vector<8x8xf32>,
    %72 = vector.extract_strided_slice %12 {offsets = [0, 24], sizes = [8, 8], strides = [1, 1]} : vector<8x32xf32> to vector<8x8xf32>
    %c3 = arith.constant 3 : index
    %c0_41 = arith.constant 0 : index
    %c0_42 = arith.constant 0 : index
    %73 = vector.load %arg13[%c3, %c0_41, %c0_42] : memref<4x8x8xf32, #tpu.memory_space<vmem>>, vector<1x8x8xf32>
    %74 = vector.shape_cast %73 : vector<1x8x8xf32> to vector<8x8xf32>
    %c3_43 = arith.constant 3 : index
    %c0_44 = arith.constant 0 : index
    %c0_45 = arith.constant 0 : index
    %75 = vector.load %arg14[%c3_43, %c0_44, %c0_45] : memref<4x8x8xf32, #tpu.memory_space<vmem>>, vector<1x8x8xf32>
    %76 = vector.shape_cast %75 : vector<1x8x8xf32> to vector<8x8xf32>
    %cst_46 = arith.constant dense<0.000000e+00> : vector<8x8xf32>
    %77 = tpu.matmul %72, %74, %cst_46 {dimension_numbers = #tpu.dot_dimension_numbers<[1], [1], [0], [0], [0, 0, 1, 0], [], []>} : vector<8x8xf32>, vector<8x8xf32>, vector<8x8xf32> -> vector<8x8xf32>
    %78 = arith.addf %77, %14 : vector<8x8xf32>
    %cst_47 = arith.constant dense<0xFF800000> : vector<8xf32>
    %79 = vector.multi_reduction <maximumf>, %78, %cst_47 [1] : vector<8x8xf32> to vector<8xf32>
    %80 = vector.shape_cast %79 : vector<8xf32> to vector<8x1xf32>
    %81 = vector.broadcast %80 : vector<8x1xf32> to vector<8x8xf32>
    %82 = arith.subf %78, %81 : vector<8x8xf32>
    %83 = math.exp %82 : vector<8x8xf32>
    %cst_48 = arith.constant dense<0.000000e+00> : vector<8xf32>
    %84 = vector.multi_reduction <add>, %83, %cst_48 [1] : vector<8x8xf32> to vector<8xf32>
    %85 = vector.shape_cast %84 : vector<8xf32> to vector<8x1xf32>
    %86 = tpu.reciprocal %85 {approx = true} : vector<8x1xf32> -> vector<8x1xf32>
    %87 = vector.broadcast %86 : vector<8x1xf32> to vector<8x8xf32>
    %88 = arith.mulf %83, %87 : vector<8x8xf32>
    %cst_49 = arith.constant dense<0.000000e+00> : vector<8x8xf32>
    %89 = tpu.matmul %88, %76, %cst_49 {dimension_numbers = #tpu.dot_dimension_numbers<[1], [0], [0], [1], [0, 0, 1, 1], [], []>} : vector<8x8xf32>, vector<8x8xf32>, vector<8x8xf32> -> vector<8x8xf32>
    %c0_50 = arith.constant 0 : index
    %c24 = arith.constant 24 : index
    %90 = vector.load %arg15[%c0_50, %c24] : memref<8x32xf32, #tpu.memory_space<vmem>>, vector<8x8xf32>
    tpu.vector_store %arg15[%c0_50, %c24], %89 {strides = array<i32>} : memref<8x32xf32, #tpu.memory_space<vmem>>, vector<8x8xf32>,
    %c0_51 = arith.constant 0 : index
    %c0_52 = arith.constant 0 : index
    %91 = vector.load %arg15[%c0_51, %c0_52] : memref<8x32xf32, #tpu.memory_space<vmem>>, vector<8x32xf32>
    %c0_53 = arith.constant 0 : index
    %c0_54 = arith.constant 0 : index
    %92 = vector.load %arg10[%c0_53, %c0_54] : memref<32x32xf32, #tpu.memory_space<vmem>>, vector<32x32xf32>
    %cst_55 = arith.constant dense<0.000000e+00> : vector<8x32xf32>
    %93 = tpu.matmul %91, %92, %cst_55 {dimension_numbers = #tpu.dot_dimension_numbers<[1], [0], [0], [1], [0, 0, 1, 1], [], []>} : vector<8x32xf32>, vector<32x32xf32>, vector<8x32xf32> -> vector<8x32xf32>
    %c0_56 = arith.constant 0 : index
    %c0_57 = arith.constant 0 : index
    %94 = vector.load %arg11[%c0_56, %c0_57] : memref<1x32xf32, #tpu.memory_space<vmem>>, vector<1x32xf32>
    %95 = vector.broadcast %94 : vector<1x32xf32> to vector<8x32xf32>
    %96 = arith.addf %93, %95 : vector<8x32xf32>
    %c0_58 = arith.constant 0 : index
    %c0_59 = arith.constant 0 : index
    %c0_60 = arith.constant 0 : index
    %97 = vector.load %arg12[%c0_58, %c0_59, %c0_60] : memref<1x8x32xf32, #tpu.memory_space<vmem>>, vector<1x8x32xf32>
    %98 = vector.shape_cast %97 : vector<1x8x32xf32> to vector<8x32xf32>
    %99 = vector.shape_cast %96 : vector<8x32xf32> to vector<1x8x32xf32>
    tpu.vector_store %arg12[%c0_58, %c0_59, %c0_60], %99 {strides = array<i32>} : memref<1x8x32xf32, #tpu.memory_space<vmem>>, vector<1x8x32xf32>,
    return
  }
  func.func @transform_0(%arg0: i32, %arg1: i32) -> (i32, i32, i32) {
    %c0_i32 = arith.constant 0 : i32
    %c0_i32_0 = arith.constant 0 : i32
    %c0_i32_1 = arith.constant 0 : i32
    return %arg0, %c0_i32, %c0_i32_0 : i32, i32, i32
  }
  func.func @transform_1(%arg0: i32, %arg1: i32) -> (i32, i32, i32) {
    %c0_i32 = arith.constant 0 : i32
    %c0_i32_0 = arith.constant 0 : i32
    return %arg0, %arg1, %c0_i32 : i32, i32, i32
  }
  func.func @transform_2(%arg0: i32, %arg1: i32) -> (i32, i32) {
    %c0_i32 = arith.constant 0 : i32
    %c0_i32_0 = arith.constant 0 : i32
    %c0_i32_1 = arith.constant 0 : i32
    return %c0_i32, %c0_i32_0 : i32, i32
  }
  func.func @transform_3(%arg0: i32, %arg1: i32) -> (i32, i32) {
    %c0_i32 = arith.constant 0 : i32
    %c0_i32_0 = arith.constant 0 : i32
    %c0_i32_1 = arith.constant 0 : i32
    return %c0_i32, %c0_i32_0 : i32, i32
  }
  func.func @transform_4(%arg0: i32, %arg1: i32) -> (i32, i32) {
    %c0_i32 = arith.constant 0 : i32
    %c0_i32_0 = arith.constant 0 : i32
    %c0_i32_1 = arith.constant 0 : i32
    return %c0_i32, %c0_i32_0 : i32, i32
  }
  func.func @transform_5(%arg0: i32, %arg1: i32) -> (i32, i32) {
    %c0_i32 = arith.constant 0 : i32
    %c0_i32_0 = arith.constant 0 : i32
    %c0_i32_1 = arith.constant 0 : i32
    return %c0_i32, %c0_i32_0 : i32, i32
  }
  func.func @transform_6(%arg0: i32, %arg1: i32) -> (i32, i32) {
    %c0_i32 = arith.constant 0 : i32
    %c0_i32_0 = arith.constant 0 : i32
    %c0_i32_1 = arith.constant 0 : i32
    return %c0_i32, %c0_i32_0 : i32, i32
  }
  func.func @transform_7(%arg0: i32, %arg1: i32) -> (i32, i32) {
    %c0_i32 = arith.constant 0 : i32
    %c0_i32_0 = arith.constant 0 : i32
    %c0_i32_1 = arith.constant 0 : i32
    return %c0_i32, %c0_i32_0 : i32, i32
  }
  func.func @transform_8(%arg0: i32, %arg1: i32) -> (i32, i32) {
    %c0_i32 = arith.constant 0 : i32
    %c0_i32_0 = arith.constant 0 : i32
    %c0_i32_1 = arith.constant 0 : i32
    return %c0_i32, %c0_i32_0 : i32, i32
  }
  func.func @transform_9(%arg0: i32, %arg1: i32) -> (i32, i32) {
    %c0_i32 = arith.constant 0 : i32
    %c0_i32_0 = arith.constant 0 : i32
    %c0_i32_1 = arith.constant 0 : i32
    return %c0_i32, %c0_i32_0 : i32, i32
  }
  func.func @transform_10(%arg0: i32, %arg1: i32) -> (i32, i32, i32) {
    %c0_i32 = arith.constant 0 : i32
    %c0_i32_0 = arith.constant 0 : i32
    return %arg0, %arg1, %c0_i32 : i32, i32, i32
  }
}

</mosaic_0001>

<bundles_post_ra>
// kernel: tpu_custom_call.1
= control target key start
LH: loop header
LB: loop body
LE: loop exit
PB: predicated region body
PF: predicated region fallthrough
CT: control target
= control target key end

     0   :  { %s1871_s0 = inlined_call_operand.hbm [shape: f32[2,8,32], index: 0, kind: input, shape index: {}]   ;;  %s1872_s1 = inlined_call_operand.hbm [shape: f32[2,8,8], index: 1, kind: input, shape index: {}]   ;;  %s1873_s2 = inlined_call_operand.hbm [shape: f32[32,32], index: 2, kind: input, shape index: {}]   ;;  %s1874_s3 = inlined_call_operand.vmem [shape: f32[1,32], index: 3, kind: input, shape index: {}]   ;;  %s1875_s4 = inlined_call_operand.hbm [shape: f32[32,32], index: 4, kind: input, shape index: {}]   ;;  %s1876_s5 = inlined_call_operand.vmem [shape: f32[1,32], index: 5, kind: input, shape index: {}]   ;;  %s1877_s6 = inlined_call_operand.hbm [shape: f32[32,32], index: 6, kind: input, shape index: {}]   ;;  %s1878_s7 = inlined_call_operand.vmem [shape: f32[1,32], index: 7, kind: input, shape index: {}]   ;;  %s1879_s8 = inlined_call_operand.hbm [shape: f32[32,32], index: 8, kind: input, shape index: {}]   ;;  %s1880_s9 = inlined_call_operand.vmem [shape: f32[1,32], index: 9, kind: input, shape index: {}]   ;;  %s1881_s10 = inlined_call_operand.hbm [shape: f32[2,8,32], index: 10, kind: output, shape index: {}]  }
   0x1   :  { %1887 = sst [smem:[#allocation29_spill]] %s1873_s2 }
   0x2   :  { %1888 = sst [smem:[#allocation30_spill]] %s1875_s4 }
   0x3   :  { %1889 = sst [smem:[#allocation31_spill]] %s1877_s6 }
   0x4   :  { %1890 = sst [smem:[#allocation32_spill]] %s1879_s8 }
   0x5   :  { %1891 = sst [smem:[#allocation33_spill]] %s1880_s9 }
   0x6   :  { %15 = vsyncpa [#allocation6], 0 }
   0x7   :  { %17 = vsyncpa [#allocation6 + $0x1], 0 }
   0x8   :  { %18 = vsyncpa [#allocation9], 0 }
   0x9   :  { %20 = vsyncpa [#allocation9 + $0x1], 0 }
   0xa   :  { %21 = vsyncpa [#allocation12], 0 }
   0xb   :  { %22 = vsyncpa [#allocation15], 0 }
   0xc   :  { %23 = vsyncpa [#allocation7], 0 }
   0xd   :  { %25 = vsyncpa [#allocation7 + $0x1], 0  ;;  %s1628_s13 = smov 0   ;;  %s1630_s14 = smov 0  }
   0xe   :  { %s1632_s15 = smov 0   ;;  %s1634_s16 = smov 0  }
   0xf   :  { %s1636_s17 = smov 0   ;;  %s1638_s18 = smov 0  }
  0x10 LB: > { %1892 = sst [smem:[#allocation23_spill]] %s1539_s13  ;;  %s1659_s19 = sadd.s32 4294967295, %s1559_s18   ;;  %s1559_s18 = sphi %s1638_s18, %s31_s18   ;;  %s1555_s17 = sphi %s1636_s17, %s1914_s17   ;;  %s1551_s16 = sphi %s1634_s16, %s1913_s16   ;;  %s1547_s15 = sphi %s1632_s15, %s1912_s15   ;;  %s1543_s14 = sphi %s1630_s14, %s1916_s14   ;;  %s1539_s13 = sphi %s1628_s13, %s1915_s13  }
  0x11   : > { %1893 = sst [smem:[#allocation24_spill]] %s1547_s15  ;;  %p1107_p0 = scmp.ge.s32.totalorder %s1559_s18, 1 }
  0x12   : > { %1894 = sst [smem:[#allocation25_spill]] %s1555_s17  ;;  %p64_p1 = scmp.eq.s32.totalorder %s1659_s19, 0 }
  0x13   : > { %p298_p2 = scmp.lt.s32.totalorder %s1559_s18, 3  ;;  %s1895_s2 = sld [smem:[#allocation29_spill]] }
  0x14   : > { %s1561_s24 = smov [#allocation10]   ;;  %p1112_p6 = scmp.ge.s32.totalorder %s1559_s18, 2 }
  0x15   : > { %p1667_p3 = pnand %p1107_p0, %p298_p2  ;;  %s311_s25 = sshll.u32 %s1561_s24, 4  ;;  %s312_s25 = int_to_ptr.vmem [resolvable:$true] %s311_s25 }
  0x16   : > { %s1898_s4 = sld [smem:[#allocation30_spill]]  ;;  %s1562_s30 = smov 128  }
  0x17   : > { %p1167_p4 = pneg %p1667_p3  ;;  %s1563_s11 = smov 8  }
  0x18   : > { %s1564_s12 = smov [#allocation11]   ;;  %s1899_s6 = sld [smem:[#allocation31_spill]] }
  0x19   : > { %s309_s22 = sshll.u32 %s1895_s2, 4  ;;  %p1675_p5 = pnand %p1167_p4, %p64_p1  ;;  %s310_s22 = int_to_ptr.hbm [resolvable:$true] %s309_s22 }
  0x1a   : > { %s328_s20 = sshll.u32 %s1564_s12, 4  ;;  %s1900_s8 = sld [smem:[#allocation32_spill]]  ;;  %s329_s20 = int_to_ptr.vmem [resolvable:$true] %s328_s20 }
  0x1b   : > { %1170 = dma.hbm_to_vmem [thread:$0]  (!%p1675_p5), %s310_s22, 512, %s312_s25, [#allocation9], %s1562_s30, %s1562_s30, %s1563_s11  }
  0x1c   : > { %s326_s29 = sshll.u32 %s1898_s4, 4  ;;  %s1565_s25 = smov [#allocation13]   ;;  %s327_s29 = int_to_ptr.hbm [resolvable:$true] %s326_s29 }
  0x1d   : > { %1173 = dma.hbm_to_vmem [thread:$0]  (!%p1675_p5), %s327_s29, 512, %s329_s20, [#allocation12], %s1562_s30, %s1562_s30, %s1563_s11  }
  0x1e   : > { %s343_s2 = sshll.u32 %s1899_s6, 4  ;;  %s345_s4 = sshll.u32 %s1565_s25, 4  ;;  %s344_s2 = int_to_ptr.hbm [resolvable:$true] %s343_s2  ;;  %s346_s4 = int_to_ptr.vmem [resolvable:$true] %s345_s4 }
  0x1f   : > { %1176 = dma.hbm_to_vmem [thread:$0]  (!%p1675_p5), %s344_s2, 512, %s346_s4, [#allocation12], %s1562_s30, %s1562_s30, %s1563_s11  }
  0x20   : > { %s360_s22 = sshll.u32 %s1900_s8, 4  ;;  %s1566_s12 = smov [#allocation14]   ;;  %s361_s22 = int_to_ptr.hbm [resolvable:$true] %s360_s22 }
  0x21   : > { %s362_s21 = sshll.u32 %s1566_s12, 4  ;;  %s1106_s29 = sadd.s32 4294967294, %s1559_s18   ;;  %s363_s21 = int_to_ptr.vmem [resolvable:$true] %s362_s21 }
  0x22   : > { %1179 = dma.hbm_to_vmem [thread:$0]  (!%p1675_p5), %s361_s22, 512, %s363_s21, [#allocation15], %s1562_s30, %s1562_s30, %s1563_s11  }
  0x23   : > { %s43_s20 = sadd.s32 1, %s1555_s17  ;;  %s50_s24 = sadd.s32 1, %s1547_s15 }
  0x24   : > { %p45_p7 = scmp.ge.s32.totalorder %s43_s20, 2  ;;  %p57_p8 = scmp.ne.s32.totalorder %s1547_s15, %s1543_s14 }
  0x25   : > { %p58_p9 = scmp.eq.s32.totalorder %s1559_s18, 0  ;;  %p63_p11 = scmp.ne.s32.totalorder %s1543_s14, %s1539_s13 }
  0x26   : > { %s1918_s20 = smov (%p45_p7, %s43_s20), 0  ;;  %p285_p12 = scmp.eq.s32.totalorder %s1659_s19, 1 }
  0x27   : > { %1901 = sst [smem:[#allocation26_spill]] %s1918_s20  ;;  %p1705_p10 = por %p58_p9, %p57_p8 }
  0x28   : > { %s47_s4 = ssub.s32 %s1555_s17, %s1918_s20  ;;  %p1716_p0 = por %p64_p1, %p63_p11 }
  0x29   : > { %p48_p13 = scmp.eq.s32.totalorder %s47_s4, 0  ;;  %p1720_p2 = por %p285_p12, %p57_p8 }
  0x2a   : > { %p291_p4 = scmp.eq.s32.totalorder %s1106_s29, 1  ;;  %p1195_p7 = scmp.lt.s32.totalorder %s1559_s18, 2 }
  0x2b   : > { %s1725_s11 = scalar_select %p48_p13, %s1547_s15, %s50_s24  }
  0x2c   : > { %p1727_p5 = por %p291_p4, %p63_p11  ;;  %s379_s28 = sand.u32 1, %s1547_s15  }
  0x2d   : > { %1905 = sst [smem:[#allocation27_spill]] %s1725_s11  ;;  %s1114_s22 = sshll.u32 %s1555_s17, 3 }
  0x2e   : > { %s1906_s27 = scalar_select %p1727_p5, 1, 0 }
  0x2f   : > { %s1113_s25 = sshll.u32 %s379_s28, 3  ;;  %s387_s4 = scalar_lea.hbm %s1871_s0, %s1114_s22 }
  0x30   : > { %1907 = sst [smem:[#allocation28_spill]] %s1906_s27  ;;  %s389_s6 = sshll.u32 %s387_s4, 4  ;;  %s390_s6 = int_to_ptr.hbm [resolvable:$true] %s389_s6 }
  0x31   : > { %s383_s8 = scalar_lea.vmem [#allocation5], %s1113_s25  ;;  %p1181_p8 = pnand %p1195_p7, %p1705_p10 }
  0x32   : > { %s391_s20 = sshll.u32 %s383_s8, 4  ;;  %s407_s11 = scalar_lea.hbm %s1872_s1, %s1114_s22  ;;  %s392_s20 = int_to_ptr.vmem [resolvable:$true] %s391_s20 }
  0x33   : > { %s398_s27 = sand.u32 1, %s1559_s18   ;;  %s380_s13 = scalar_lea.sflag [#allocation6], %s379_s28 }
  0x34   : > { %1183 = dma.hbm_to_vmem [thread:$0]  (!%p1181_p8), %s390_s6, 128, %s392_s20, %s380_s13  }
  0x35   : > { %s409_s17 = sshll.u32 %s407_s11, 4  ;;  %s402_s15 = scalar_lea.vmem [#allocation8], %s1113_s25  ;;  %s410_s17 = int_to_ptr.hbm [resolvable:$true] %s409_s17 }
  0x36   : > { %s411_s9 = sshll.u32 %s402_s15, 4  ;;  %s399_s12 = scalar_lea.sflag [#allocation9], %s398_s27  ;;  %s412_s9 = int_to_ptr.vmem [resolvable:$true] %s411_s9 }
  0x37   : > { %1186 = dma.hbm_to_vmem [thread:$0]  (!%p1181_p8), %s410_s17, 128, %s412_s9, %s399_s12  }
  0x38   : > { %420 = sbr.rel (%p1667_p3) target bundleno = 1140 (0x474), region = 60  ;;  %s1746_s8 = sand.u32 (!%p1667_p3), 1, %s1543_s14  }
  0x39   : > { %s1749_s2 = sshll.u32 (!%p1667_p3), %s1746_s8, 3  ;;  %s423_s6 = scalar_lea.sflag (!%p1667_p3), [#allocation6], %s1746_s8 }
  0x3a   : > { %s426_s13 = scalar_lea.vmem (!%p1667_p3), [#allocation5], %s1749_s2 }
  0x3d   : > { %1514 = dma.done.wait (%p1716_p0), %s423_s6, 128  }
  0x3e   : > { %1516 = vsyncadd (%p1716_p0), %s423_s6, 4294967168  ;;  %s432_s9 = sand.u32 1, %s1659_s19   ;;  %s436_s17 = scalar_lea.vmem [#allocation8], %s1749_s2 }
  0x3f   : > { %s433_s15 = scalar_lea.sflag [#allocation9], %s432_s9 }
  0x40   : > { %1518 = dma.done.wait (%p1716_p0), %s433_s15, 128  }
  0x41   : > { %1520 = vsyncadd (%p1716_p0), %s433_s15, 4294967168 }
  0x42   : > { %1522 = dma.done.wait (%p64_p1), [#allocation9], 512  }
  0x43   : > { %1524 = vsyncadd (%p64_p1), [#allocation9], 4294966784 }
  0x44   : > { %1526 = dma.done.wait (%p64_p1), [#allocation12], 1024  }
  0x45   : > { %1528 = vsyncadd (%p64_p1), [#allocation12], 4294966272 }
  0x46   : > { %1530 = dma.done.wait (%p64_p1), [#allocation15], 512  }
  0x47   : > { %1532 = vsyncadd (%p64_p1), [#allocation15], 4294966784  ;;  %v507_v0 = vld [vmem:[#allocation11 + $0x18] sm:$0xff]  ;;  %v506_v2 = vld [vmem:[#allocation11 + $0x10] sm:$0xff]  ;;  %vm512_vm0 = vcmask 261120   ;;  %vm536_vm1 = vcmask 64512  }
  0x48   : > { %v605_v1 = vld [vmem:[#allocation10 + $0x18] sm:$0xff]  ;;  %528 = vmatpush.msra.mxu0 %v507_v0  ;;  %v604_v3 = vld [vmem:[#allocation10 + $0x10] sm:$0xff]  ;;  %v505_v4 = vld [vmem:[#allocation11 + $0x8] sm:$0xff]  ;;  %s1567_s20 = smov 112   ;;  %s1568_s27 = smov 120   ;;  %vm768_vm2 = vcmask 130112  }
  0x49   : > { %626 = vmatpush.msra.mxu2 %v605_v1  ;;  %v603_v5 = vld [vmem:[#allocation10 + $0x8] sm:$0xff]  ;;  %v504_v6 = vld [vmem:[#allocation11] sm:$0xff]  ;;  %v1261_v9 = vld [vmem:[%s1876_s5] ss:$0 sm:$0xff]  ;;  %s1569_s28 = smov 104   ;;  %s1570_s21 = smov 8  }
  0x4a   : > { %529 = vmatpush.msra.mxu0 %v506_v2  ;;  %v602_v7 = vld [vmem:[#allocation10] sm:$0xff]  ;;  %v1262_v12 = vld [vmem:[%s1874_s3] ss:$0 sm:$0xff]  ;;  %v556_v18 = vld [vmem:[#allocation13 + $0x10] sm:$0xff]  ;;  %s1571_s4 = smov 24   ;;  %s1572_s29 = smov 16  }
  0x4b   : > { %627 = vmatpush.msra.mxu2 %v604_v3  ;;  %v503_v8 = vld [vmem:[%s426_s13] sm:$0xff]  ;;  %v557_v17 = vld [vmem:[#allocation13 + $0x18] sm:$0xff]  ;;  %vm839_vm3 = vcmask 195712   ;;  %vm910_vm4 = vcmask 261312   ;;  %s1142_s24 = sshll.u32 %s1551_s16, 3  ;;  %s498_s19 = scalar_lea.vmem [#allocation16], %s1749_s2 }
  0x4c   : > { %530 = vmatpush.msra.mxu0 %v505_v4  ;;  %574 = vmatpush.msra.mxu1 %v557_v17  ;;  %v634_v26 = vld [vmem:[%s436_s17] sm:$0xff]  ;;  %v555_v31 = vld [vmem:[#allocation13 + $0x8] sm:$0xff]  ;;  %v554_v32 = vld [vmem:[#allocation13] sm:$0xff]  ;;  %s957_s13 = scalar_lea.hbm %s1881_s10, %s1142_s24  ;;  %s1908_s17 = sld [smem:[#allocation33_spill]] }
  0x4d   : > { %628 = vmatpush.msra.mxu2 %v603_v5  ;;  %v1263_v47 = vld [vmem:[%s1878_s7] ss:$0 sm:$0xff]  ;;  %s959_s23 = sshll.u32 %s498_s19, 4  ;;  %s946_s26 = scalar_lea.sflag [#allocation7], %s1746_s8  ;;  %s960_s23 = int_to_ptr.vmem [resolvable:$true] %s959_s23 }
  0x4e   : > { %531 = vmatpush.msra.mxu0 %v504_v6  ;;  %575 = vmatpush.msra.mxu1 %v556_v18  ;;  %s1481_s2 = scalar_lea.hbm %s1881_s10, 16 }
  0x4f   : > { %629 = vmatpush.msra.mxu2 %v602_v7  ;;  %1125 = vmatmul.msk.f32.vlgmr.msra.gmra.mxu0 %vm512_vm0, %v503_v8 }
  0x50   : > { %1127 = vmatmul.msk.f32.vlgmr.msra.gmra.mxu2 %vm512_vm0, %v503_v8  ;;  %576 = vmatpush.msra.mxu1 %v555_v31 }
  0x52   : > { %577 = vmatpush.msra.mxu1 %v554_v32  ;;  %v1264_v32 = vld [vmem:[%s1908_s17] ss:$0 sm:$0xff] }
  0x53   : > { %1126 = vmatmul.msk.f32.vlgmr.msra.gmra.mxu1 %vm512_vm0, %v503_v8 }
  0xcc   : > { %v533_v10 = vpop.f32.mrf.mxu0 }
  0xcd   : > { %v534_v11 = vadd.f32 %v1261_v9, %v533_v10 }
  0xcf   : > { %537 = vst.msk [vmem:[#allocation2] sm:$0xff] %vm536_vm1, %v534_v11  ;;  %544 = vrot.lane.b32.xlu0 %v534_v11, %s1567_s20 }
  0xd0   : > { %v579_v48 = vpop.f32.mrf.mxu1 }
  0xd1   : > { %v580_v49 = vadd.f32 %v1263_v47, %v579_v48 }
  0xd3   : > { %v631_v13 = vpop.f32.mrf.mxu2  ;;  %582 = vst.msk [vmem:[#allocation3] sm:$0xff] %vm536_vm1, %v580_v49 }
  0xd4   : > { %v632_v14 = vadd.f32 %v1262_v12, %v631_v13 }
  0xd6   : > { %774 = vrot.lane.b32.xlu1 %v632_v14, %s1567_s20  ;;  %703 = vrot.lane.b32.xlu2 %v632_v14, %s1568_s27  ;;  %v635_v15 = vld [vmem:[#allocation2] sm:$0xff] }
  0xd7   : > { %539 = vrot.lane.b32.xlu0 %v534_v11, %s1568_s27  ;;  %1128 = vmatpush.xpose.msk.msra.mxu3 %vm536_vm1, %v635_v15 }
  0xda   : > { %1129 = vmatmul.msk.f32.vlgmr.msra.gmra.mxu3 %vm536_vm1, %v632_v14  ;;  %v636_v50 = vld [vmem:[#allocation3] sm:$0xff] }
  0xdb   : > { %693 = vmatpush.msrb.mxu3 %v636_v50 }
  0xde   : > { %549 = vrot.lane.b32.xlu1 %v534_v11, %s1569_s28  ;;  %845 = vrot.lane.b32.xlu2 %v632_v14, %s1569_s28 }
 0x130   : > { %v704_v24 = vpop.permute.xlu2 %703 }
 0x138   : > { %v846_v27 = vpop.permute.xlu2 %845 }
 0x141   : > { %v545_v16 = vpop.permute.xlu0 %544 }
 0x142   : > { %548 = vst.msk [vmem:[#allocation2 + $0x10] sm:$0xff] %vm536_vm1, %v545_v16 }
 0x148   : > { %v775_v19 = vpop.permute.xlu1 %774 }
 0x149   : > { %v540_v20 = vpop.permute.xlu0 %539  ;;  %v771_v21 = vld [vmem:[#allocation2 + $0x10] sm:$0xff] }
 0x14a   : > { %543 = vst.msk [vmem:[#allocation2 + $0x8] sm:$0xff] %vm536_vm1, %v540_v20  ;;  %1134 = vmatpush.xpose.msk.msrb.mxu2 %vm536_vm1, %v771_v21 }
 0x14d   : > { %1135 = vmatmul.msk.f32.vlgmr.msrb.gmra.mxu2 %vm536_vm1, %v775_v19 }
 0x150   : > { %v550_v22 = vpop.permute.xlu1 %549 }
 0x151   : > { %553 = vst.msk [vmem:[#allocation2 + $0x18] sm:$0xff] %vm536_vm1, %v550_v22  ;;  %v700_v23 = vld [vmem:[#allocation2 + $0x8] sm:$0xff] }
 0x152   : > { %1131 = vmatpush.xpose.msk.msrb.mxu0 %vm536_vm1, %v700_v23 }
 0x155   : > { %1132 = vmatmul.msk.f32.vlgmr.msrb.gmra.mxu0 %vm536_vm1, %v704_v24 }
 0x158   : > { %v842_v25 = vld [vmem:[#allocation2 + $0x18] sm:$0xff] }
 0x159   : > { %1137 = vmatpush.xpose.msk.msra.mxu0 %vm536_vm1, %v842_v25  ;;  %v916_v25 = vld [vmem:[#allocation14 + $0x18] sm:$0xff] }
 0x15a   : > { %936 = vmatpush.msra.mxu2 %v916_v25 }
 0x15d   : > { %v661_v28 = vpop.f32.mrf.mxu3  ;;  %1138 = vmatmul.msk.f32.vlgmr.msra.gmra.mxu0 %vm536_vm1, %v846_v27  ;;  %v914_v27 = vld [vmem:[#allocation14 + $0x8] sm:$0xff] }
 0x15e   : > { %v662_v29 = vadd.f32 %v661_v28, %v634_v26  ;;  %v913_v28 = vld [vmem:[#allocation14] sm:$0xff] }
 0x160   : > { %v664_v30 = vsel %vm536_vm1, %v662_v29, -inf }
 0x161   : > { %665 = vmax.xlane.f32.xlu0 %v664_v30 }
 0x1d0   : > { %v798_v33 = vpop.f32.mrf.mxu2 }
 0x1d1   : > { %v799_v34 = vadd.f32 %v798_v33, %v634_v26 }
 0x1d2   : > { %v727_v35 = vpop.f32.mrf.mxu0 }
 0x1d3   : > { %v728_v36 = vadd.f32 %v727_v35, %v634_v26  ;;  %v801_v37 = vsel %vm536_vm1, %v799_v34, -inf }
 0x1d4   : > { %802 = vmax.xlane.f32.xlu2 %v801_v37  ;;  %v666_v38 = vpop.xlane.xlu0 %665 }
 0x1d5   : > { %v667_v39 = vsub.f32 %v662_v29, %v666_v38  ;;  %v730_v40 = vsel %vm536_vm1, %v728_v36, -inf }
 0x1d6   : > { %731 = vmax.xlane.f32.xlu1 %v730_v40 }
 0x1d7   : > { %v668_v41 = vmul.f32 1.442695, %v667_v39 }
 0x1d9   : > { %1265 = vpow2.f32 %v668_v41 }
 0x1da   : > { %v869_v42 = vpop.f32.mrf.mxu0 }
 0x1db   : > { %v870_v43 = vadd.f32 %v869_v42, %v634_v26  ;;  %v915_v26 = vld [vmem:[#allocation14 + $0x10] sm:$0xff] }
 0x1dc   : > { %937 = vmatpush.msra.mxu2 %v915_v26 }
 0x1dd   : > { %v872_v44 = vsel %vm536_vm1, %v870_v43, -inf }
 0x1de   : > { %873 = vmax.xlane.f32.xlu2 %v872_v44  ;;  %938 = vmatpush.msra.mxu2 %v914_v27 }
 0x1df   : > { %v1266_v45 = vpop.eup %1265 }
 0x1e0   : > { %v670_v46 = vsel %vm536_vm1, %v1266_v45, 0.0  ;;  %939 = vmatpush.msra.mxu2 %v913_v28 }
 0x1e1   : > { %671 = vadd.xlane.f32.xlu0 %v670_v46 }
 0x1f6   : > { %584 = vrot.lane.b32.xlu2 %v580_v49, %s1568_s27 }
 0x247   : > { %v803_v51 = vpop.xlane.xlu2 %802 }
 0x248   : > { %v804_v52 = vsub.f32 %v799_v34, %v803_v51 }
 0x249   : > { %v732_v53 = vpop.xlane.xlu1 %731 }
 0x24a   : > { %v805_v54 = vmul.f32 1.442695, %v804_v52  ;;  %v733_v55 = vsub.f32 %v728_v36, %v732_v53 }
 0x24c   : > { %1267 = vpow2.f32 %v805_v54  ;;  %v734_v56 = vmul.f32 1.442695, %v733_v55 }
 0x24e   : > { %1269 = vpow2.f32 %v734_v56 }
 0x251   : > { %v874_v57 = vpop.xlane.xlu2 %873 }
 0x252   : > { %v1268_v58 = vpop.eup %1267  ;;  %v875_v59 = vsub.f32 %v870_v43, %v874_v57 }
 0x253   : > { %v807_v60 = vsel %vm536_vm1, %v1268_v58, 0.0 }
 0x254   : > { %v1270_v61 = vpop.eup %1269  ;;  %v876_v62 = vmul.f32 1.442695, %v875_v59  ;;  %808 = vadd.xlane.f32.xlu0 %v807_v60  ;;  %v672_v63 = vpop.xlane.xlu0 %671 }
 0x255   : > { %1271 = vrcp.f32 %v672_v63  ;;  %v736_v0 = vsel %vm536_vm1, %v1270_v61, 0.0 }
 0x256   : > { %1273 = vpow2.f32 %v876_v62  ;;  %737 = vadd.xlane.f32.xlu1 %v736_v0 }
 0x259   : > { %v585_v5 = vpop.permute.xlu2 %584 }
 0x25a   : > { %588 = vst.msk [vmem:[#allocation3 + $0x8] sm:$0xff] %vm536_vm1, %v585_v5 }
 0x25b   : > { %v1272_v1 = vpop.eup %1271 }
 0x25c   : > { %v1274_v2 = vpop.eup %1273  ;;  %v674_v3 = vmul.f32 %v1272_v1, %v1266_v45 }
 0x25d   : > { %v878_v4 = vsel %vm536_vm1, %v1274_v2, 0.0 }
 0x25e   : > { %879 = vadd.xlane.f32.xlu0 %v878_v4  ;;  %1130 = vmatmul.msk.f32.vlgmr.msrb.gmra.mxu3 %vm536_vm1, %v674_v3 }
 0x261   : > { %v702_v6 = vld [vmem:[#allocation3 + $0x8] sm:$0xff] }
 0x262   : > { %759 = vmatpush.msrb.mxu1 %v702_v6 }
 0x26f   : > { %589 = vrot.lane.b32.xlu1 %v580_v49, %s1567_s20  ;;  %s961_s20 = sshll.u32 %s957_s13, 4  ;;  %s962_s20 = int_to_ptr.hbm [resolvable:$true] %s961_s20 }
 0x270   : > { %s1475_s16 = sshra.s32 %s962_s20, 4  ;;  %s1476_s16 = int_to_ptr.hbm [resolvable:$true] %s1475_s16 }
 0x271   : > { %s1477_s11 = scalar_lea.hbm %s1476_s16, 8  ;;  %p1482_p10 = scmp.lt.s32.totalorder %s1476_s16, %s1881_s10 }
 0x272   : > { %594 = vrot.lane.b32.xlu0 %v580_v49, %s1569_s28  ;;  %p1478_p1 = scmp.ne.s32.totalorder %s1476_s16, %s1477_s11  ;;  %p1483_p11 = scmp.lt.s32.totalorder %s1481_s2, %s1477_s11 }
 0x274   : > { %p1479_p3 = pnand %p1478_p1, %p1720_p2  ;;  %p1484_p12 = por %p1483_p11, %p1482_p10 }
 0x276   : > { %p1480_p9 = pneg %p1479_p3 }
 0x278   : > { %p1485_p13 = pnand %p1484_p12, %p1480_p9 }
 0x2c7   : > { %v809_v10 = vpop.xlane.xlu0 %808 }
 0x2c9   : > { %v738_v7 = vpop.xlane.xlu1 %737 }
 0x2ca   : > { %1275 = vrcp.f32 %v738_v7 }
 0x2cb   : > { %1277 = vrcp.f32 %v809_v10 }
 0x2d0   : > { %v1276_v8 = vpop.eup %1275 }
 0x2d1   : > { %v740_v9 = vmul.f32 %v1276_v8, %v1270_v61  ;;  %v880_v11 = vpop.xlane.xlu0 %879  ;;  %v1278_v15 = vpop.eup %1277 }
 0x2d2   : > { %1279 = vrcp.f32 %v880_v11  ;;  %v811_v17 = vmul.f32 %v1278_v15, %v1268_v58 }
 0x2d3   : > { %1133 = vmatmul.msk.f32.vlgmr.msrb.gmra.mxu1 %vm536_vm1, %v740_v9 }
 0x2d8   : > { %v1280_v16 = vpop.eup %1279 }
 0x2d9   : > { %v882_v19 = vmul.f32 %v1280_v16, %v1274_v2 }
 0x2e1   : > { %v590_v12 = vpop.permute.xlu1 %589  ;;  %v695_v13 = vpop.f32.mrf.mxu3 }
 0x2e2   : > { %593 = vst.msk [vmem:[#allocation3 + $0x10] sm:$0xff] %vm536_vm1, %v590_v12 }
 0x2e3   : > { %698 = vst.msk [vmem:[#allocation4] sm:$0xff] %vm536_vm1, %v695_v13 }
 0x2e4   : > { %v595_v14 = vpop.permute.xlu0 %594 }
 0x2e5   : > { %598 = vst.msk [vmem:[#allocation3 + $0x18] sm:$0xff] %vm536_vm1, %v595_v14 }
 0x2e9   : > { %v773_v18 = vld [vmem:[#allocation3 + $0x10] sm:$0xff] }
 0x2ea   : > { %830 = vmatpush.msra.mxu3 %v773_v18 }
 0x2eb   : > { %1136 = vmatmul.msk.f32.vlgmr.msra.gmra.mxu3 %vm536_vm1, %v811_v17 }
 0x2ec   : > { %v844_v20 = vld [vmem:[#allocation3 + $0x18] sm:$0xff] }
 0x2ed   : > { %901 = vmatpush.msra.mxu1 %v844_v20 }
 0x2ee   : > { %1139 = vmatmul.msk.f32.vlgmr.msra.gmra.mxu1 %vm536_vm1, %v882_v19 }
 0x350   : > { %v761_v21 = vpop.f32.mrf.mxu1 }
 0x351   : > { %765 = vrot.lane.b32.xlu2 %v761_v21, %s1570_s21 }
 0x36b   : > { %v903_v22 = vpop.f32.mrf.mxu1 }
 0x36c   : > { %907 = vrot.lane.b32.xlu2 %v903_v22, %s1571_s4 }
 0x36e   : > { %v832_v23 = vpop.f32.mrf.mxu3 }
 0x36f   : > { %836 = vrot.lane.b32.xlu1 %v832_v23, %s1572_s29 }
 0x3ab   : > { %v766_v24 = vpop.permute.xlu2 %765 }
 0x3ac   : > { %769 = vst.msk [vmem:[#allocation4] sm:$0xff] %vm768_vm2, %v766_v24 }
 0x3c6   : > { %v908_v30 = vpop.permute.xlu2 %907 }
 0x3e1   : > { %v837_v29 = vpop.permute.xlu1 %836 }
 0x3e2   : > { %840 = vst.msk [vmem:[#allocation4] sm:$0xff] %vm839_vm3, %v837_v29 }
 0x3e3   : > { %911 = vst.msk [vmem:[#allocation4] sm:$0xff] %vm910_vm4, %v908_v30 }
 0x3ea   : > { %v912_v31 = vld [vmem:[#allocation4] sm:$0xff] }
 0x3eb   : > { %1140 = vmatmul.msk.f32.vlgmr.msra.gmra.mxu2 %vm512_vm0, %v912_v31 }
 0x46e   : > { %v941_v33 = vpop.f32.mrf.mxu2 }
 0x46f   : > { %v942_v34 = vadd.f32 %v1264_v32, %v941_v33 }
 0x471   : > { %944 = vst.msk [vmem:[%s498_s19] sm:$0xff] %vm512_vm0, %v942_v34 }
 0x472   : > { %1488 = shalt.err (!%p1485_p13)
}
 0x473   : > { %1165 = dma.vmem_to_hbm [thread:$0]  (%p1720_p2), %s960_s23, 128, %s962_s20, %s946_s26  }
 0x474 PF: > { %s1909_s8 = sld [smem:[#allocation23_spill]]  ;;  %p1188_p0 = pnand %p1112_p6, %p1727_p5 }
 0x476   : > { %p1189_p4 = pneg %p1188_p0 }
 0x47a   : > { %s973_s4 = sand.u32 1, %s1909_s8  }
 0x47b   : > { %s974_s29 = scalar_lea.sflag [#allocation7], %s973_s4 }
 0x47c   : > { %1534 = dma.done.wait (%p1189_p4), %s974_s29, 128  }
 0x47d   : > { %1536 = vsyncadd (%p1189_p4), %s974_s29, 4294967168  ;;  %s31_s18 = sadd.s32 1, %s1559_s18   ;;  %s1911_s24 = sld [smem:[#allocation24_spill]] }
 0x47e   : > { %p28_p7 = scmp.ge.s32.totalorder %s31_s18, 4   ;;  %s1912_s15 = sld [smem:[#allocation27_spill]] }
 0x47f   : > { %s1913_s16 = sld [smem:[#allocation25_spill]]  ;;  %s1915_s13 = smov %s1543_s14 }
 0x480   : > { %s1914_s17 = sld [smem:[#allocation26_spill]]  ;;  %30 = sbr.rel (!%p28_p7) target bundleno = 16 (0x10), region = 151 }
 0x483   : > { %s1916_s14 = smov %s1911_s24 }
 0x485   :  { %980 = vsyncpa [#allocation6], 1 }
 0x486   :  { %982 = vsyncpa [#allocation6 + $0x1], 1 }
 0x487   :  { %983 = vsyncpa [#allocation9], 1 }
 0x488   :  { %985 = vsyncpa [#allocation9 + $0x1], 1 }
 0x489   :  { %986 = vsyncpa [#allocation12], 1 }
 0x48a   :  { %987 = vsyncpa [#allocation15], 1 }
 0x48b   :  { %988 = vsyncpa [#allocation7], 1 }
 0x48c   :  { %990 = vsyncpa [#allocation7 + $0x1], 1 }

</bundles_post_ra>
